<compile_context>
chip_gen: v6e
topology: v6e:2x2x1
jax: 0.10.0
libtpu: 0.0.40
codegen_flags: <defaults>
</compile_context>

<pallas_src>
import functools

import jax
import jax.numpy as jnp
from jax import lax
from jax.experimental import pallas as pl
from jax.experimental.pallas import tpu as pltpu


def _round_up(x, m):
    return (x + m - 1) // m * m


def _divisor_tile(n, cap, quantum=128):
    """Largest multiple of `quantum` dividing n (n % quantum == 0), <= max(cap, quantum)."""
    t = max(min(cap, n), quantum)
    t = (t // quantum) * quantum
    while n % t != 0:
        t -= quantum
    return t


# ---------------------------------------------------------------------------
# Kernel 1: support = x @ W (row-tiled, bf16 output, casts done in-kernel).
# ---------------------------------------------------------------------------
def support_kernel(x_ref, w_ref, o_ref):
    o_ref[...] = jnp.dot(
        x_ref[...].astype(jnp.bfloat16),
        w_ref[...].astype(jnp.bfloat16),
        preferred_element_type=jnp.float32,
    ).astype(o_ref.dtype)


# ---------------------------------------------------------------------------
# Shared epilogue: bias -> relu -> (eval-mode dropout = identity) -> log_softmax
# over the real nhid lanes (padded lanes masked to -inf, zeroed on store).
# ---------------------------------------------------------------------------
def _epilogue(acc, bias_row, nhid, nhid_p, with_relu):
    out = acc + bias_row
    if with_relu:
        out = jnp.maximum(out, 0.0)
    # TODO(synk): F.dropout is identity in eval mode; training-mode dropout
    # (random mask + 1/(1-p) scaling) is intentionally omitted.
    if nhid == nhid_p:
        m = jnp.max(out, axis=-1, keepdims=True)
        shifted = out - m
        lse = jnp.log(jnp.sum(jnp.exp(shifted), axis=-1, keepdims=True))
        return shifted - lse
    lane = lax.broadcasted_iota(jnp.int32, out.shape, dimension=1)
    valid = lane < nhid
    masked = jnp.where(valid, out, -jnp.inf)
    m = jnp.max(masked, axis=-1, keepdims=True)
    shifted = masked - m
    lse = jnp.log(jnp.sum(jnp.exp(shifted), axis=-1, keepdims=True))
    return jnp.where(valid, shifted - lse, 0.0)


# ---------------------------------------------------------------------------
# Kernel 2a (collapsed K): full-width adj row slab x resident support per step.
# ---------------------------------------------------------------------------
def gcn_agg_full_kernel(adj_ref, sup_ref, b_ref, o_ref, *, nhid, nhid_p, with_relu):
    acc = jnp.dot(adj_ref[...].astype(jnp.bfloat16), sup_ref[...],
                  preferred_element_type=jnp.float32)
    o_ref[...] = _epilogue(acc, b_ref[...], nhid, nhid_p, with_relu).astype(o_ref.dtype)


# ---------------------------------------------------------------------------
# Kernel 2b (K-tiled): (row, K) grid, f32 accumulator scratch, finalize at last K.
# Support is either resident (sliced by K in-kernel) or streamed per K tile.
# ---------------------------------------------------------------------------
def gcn_agg_ktiled_kernel(adj_ref, sup_ref, b_ref, o_ref, acc_ref, *,
                          nhid, nhid_p, with_relu, tk, sup_resident):
    k = pl.program_id(1)

    @pl.when(k == 0)
    def _():
        acc_ref[...] = jnp.zeros_like(acc_ref)

    adj = adj_ref[...].astype(jnp.bfloat16)
    if sup_resident:
        start = pl.multiple_of(k * tk, 128)
        sup = sup_ref[pl.ds(start, tk), :]
    else:
        sup = sup_ref[...]
    acc_ref[...] += jnp.dot(adj, sup, preferred_element_type=jnp.float32)

    @pl.when(k == pl.num_programs(1) - 1)
    def _():
        o_ref[...] = _epilogue(acc_ref[...], b_ref[...], nhid, nhid_p,
                               with_relu).astype(o_ref.dtype)


# ---------------------------------------------------------------------------
# Wrapper
# ---------------------------------------------------------------------------
def gcn_onelayer_forward(x, adj, weight, bias, *, with_relu=True,
                         tm=512, tk=2048, vmem_budget_bytes=48 << 20):
    """log_softmax(relu(adj @ (x @ W) + b), axis=1) == GCN_OneLayer.forward (eval).

    vmem_budget_bytes defaults to 48 MiB (safe on v7x's 64 MiB); v5e/v6e callers
    may raise it to push the collapsed-K path to larger graphs.
    """
    N, nfeat = x.shape
    nhid = weight.shape[1]
    f32, bf16 = jnp.float32, jnp.bfloat16

    nhid_p = _round_up(max(nhid, 128), 128)     # lane-dense hidden dim
    n_p = _round_up(N, 128)                     # padding quantum is 128 only
    tm = _divisor_tile(n_p, tm)                 # row tile: 128-multiple dividing n_p

    # Pad where required; no extra dtype-cast passes over adj (dominant stream).
    adj_p = adj if adj.dtype in (f32, bf16) else adj.astype(f32)
    if n_p != N:
        adj_p = jnp.zeros((n_p, n_p), adj_p.dtype).at[:N, :N].set(adj_p)
    adj_item = jnp.dtype(adj_p.dtype).itemsize

    x_p = x.astype(f32)
    if n_p != N:
        x_p = jnp.zeros((n_p, nfeat), f32).at[:N].set(x_p)

    w_p = weight.astype(f32)
    if nhid_p != nhid:
        w_p = jnp.zeros((nfeat, nhid_p), f32).at[:, :nhid].set(w_p)

    b_p = jnp.zeros((1, nhid_p), f32).at[:, :nhid].set(
        bias.reshape(1, nhid).astype(f32))

    # --- support = x @ W (computed once, stored bf16) ---
    support = pl.pallas_call(
        support_kernel,
        out_shape=jax.ShapeDtypeStruct((n_p, nhid_p), bf16),
        grid=(n_p // tm,),
        in_specs=[
            pl.BlockSpec((tm, nfeat), lambda i: (i, 0)),
            pl.BlockSpec((nfeat, nhid_p), lambda i: (0, 0)),
        ],
        out_specs=pl.BlockSpec((tm, nhid_p), lambda i: (i, 0)),
        compiler_params=pltpu.CompilerParams(
            dimension_semantics=("parallel",)),
    )(x_p, w_p)

    # --- VMEM bookkeeping (budget 2 buffers per pipelined operand) ---
    headroom = 8 << 20
    sup_resident_bytes = 2 * n_p * nhid_p * 2      # bf16, resident (budget x2)
    out_bytes = 2 * tm * nhid_p * 4                # f32 output tile
    bias_bytes = 2 * nhid_p * 4

    # Path A: K axis collapsed -- one full-width adj row slab per grid step.
    slab_total = (2 * tm * n_p * adj_item + sup_resident_bytes
                  + out_bytes + bias_bytes + headroom)

    if slab_total <= vmem_budget_bytes:
        out_p = pl.pallas_call(
            functools.partial(gcn_agg_full_kernel, nhid=nhid, nhid_p=nhid_p,
                              with_relu=with_relu),
            out_shape=jax.ShapeDtypeStruct((n_p, nhid_p), f32),
            grid=(n_p // tm,),
            in_specs=[
                pl.BlockSpec((tm, n_p), lambda i: (i, 0)),        # adj row slab
                pl.BlockSpec((n_p, nhid_p), lambda i: (0, 0)),    # support (resident)
                pl.BlockSpec((1, nhid_p), lambda i: (0, 0)),      # bias
            ],
            out_specs=pl.BlockSpec((tm, nhid_p), lambda i: (i, 0)),
            compiler_params=pltpu.CompilerParams(
                dimension_semantics=("parallel",),
                vmem_limit_bytes=int(slab_total)),
        )(adj_p, support, b_p)
    else:
        # Path B: (row, K) grid with f32 accumulator; support resident when it
        # fits (<= ~24 MiB budget), else K-tiled alongside adj.
        acc_bytes = tm * nhid_p * 4
        sup_resident = sup_resident_bytes <= (24 << 20)
        if sup_resident:
            fixed = sup_resident_bytes + out_bytes + bias_bytes + acc_bytes + headroom
            per_tk = 2 * tm * adj_item
        else:
            fixed = out_bytes + bias_bytes + acc_bytes + headroom
            per_tk = 2 * tm * adj_item + 2 * nhid_p * 2
        tk_cap = max(128, (vmem_budget_bytes - fixed) // per_tk)
        tk = _divisor_tile(n_p, min(tk, tk_cap))
        vmem_limit = fixed + per_tk * tk

        if sup_resident:
            sup_spec = pl.BlockSpec((n_p, nhid_p), lambda i, k: (0, 0))
        else:
            sup_spec = pl.BlockSpec((tk, nhid_p), lambda i, k: (k, 0))

        out_p = pl.pallas_call(
            functools.partial(gcn_agg_ktiled_kernel, nhid=nhid, nhid_p=nhid_p,
                              with_relu=with_relu, tk=tk,
                              sup_resident=sup_resident),
            out_shape=jax.ShapeDtypeStruct((n_p, nhid_p), f32),
            grid=(n_p // tm, n_p // tk),
            in_specs=[
                pl.BlockSpec((tm, tk), lambda i, k: (i, k)),      # adj
                sup_spec,                                         # support
                pl.BlockSpec((1, nhid_p), lambda i, k: (0, 0)),   # bias
            ],
            out_specs=pl.BlockSpec((tm, nhid_p), lambda i, k: (i, 0)),
            scratch_shapes=[pltpu.VMEM((tm, nhid_p), f32)],
            compiler_params=pltpu.CompilerParams(
                dimension_semantics=("parallel", "arbitrary"),
                vmem_limit_bytes=int(vmem_limit)),
        )(adj_p, support, b_p)

    return out_p[:N, :nhid]


# ---------------------------------------------------------------------------
# References
# ---------------------------------------------------------------------------
def _reference_f32(x, adj, weight, bias, with_relu=True):
    support = x @ weight
    out = adj @ support + bias
    if with_relu:
        out = jnp.maximum(out, 0.0)
    return jax.nn.log_softmax(out, axis=1)


def _reference_matched(x, adj, weight, bias, with_relu=True):
    # Same bf16-operand / f32-accumulation precision as the kernels.
    support = jnp.dot(x.astype(jnp.bfloat16), weight.astype(jnp.bfloat16),
                      preferred_element_type=jnp.float32).astype(jnp.bfloat16)
    out = jnp.dot(adj.astype(jnp.bfloat16), support,
                  preferred_element_type=jnp.float32) + bias
    if with_relu:
        out = jnp.maximum(out, 0.0)
    return jax.nn.log_softmax(out, axis=1)


if __name__ == "__main__":
    N, nfeat, nhid = 512, 64, 16

    key = jax.random.PRNGKey(0)
    k_x, k_adj, k_w, k_b = jax.random.split(key, 4)

    x = jax.random.normal(k_x, (N, nfeat), dtype=jnp.float32)

    # Symmetric adjacency with self-loops, row-normalized (as GCN would use).
    a = (jax.random.uniform(k_adj, (N, N)) > 0.9).astype(jnp.float32)
    a = jnp.maximum(a, a.T)
    a = a + jnp.eye(N, dtype=jnp.float32)
    adj = a / jnp.sum(a, axis=1, keepdims=True)

    # Deterministic init matching GraphConvolution.reset_parameters.
    stdv = 1.0 / (nhid ** 0.5)
    weight = jax.random.uniform(k_w, (nfeat, nhid), dtype=jnp.float32,
                                minval=-stdv, maxval=stdv)
    bias = jax.random.uniform(k_b, (nhid,), dtype=jnp.float32,
                              minval=-stdv, maxval=stdv)

    # Path A: collapsed-K (full adj row slab + resident support in VMEM).
    out = jax.block_until_ready(gcn_onelayer_forward(x, adj, weight, bias))
    # Path B: force the (row, K) accumulator path via a tiny VMEM budget.
    out_kt = jax.block_until_ready(
        gcn_onelayer_forward(x, adj, weight, bias, tm=256, tk=256,
                             vmem_budget_bytes=1 << 20))

    ref_matched = _reference_matched(x, adj, weight, bias)
    ref_f32 = _reference_f32(x, adj, weight, bias)

    for o in (out, out_kt):
        assert o.shape == (N, nhid)
        assert jnp.all(jnp.isfinite(o)), "non-finite values in output"
        assert jnp.allclose(o, ref_matched, atol=5e-3, rtol=5e-3), \
            "mismatch vs matched-precision (bf16 matmul) reference"
        assert jnp.allclose(o, ref_f32, atol=5e-2), \
            "mismatch vs full-f32 reference"

    print("KERNEL_OK")
</pallas_src>

<mosaic_0001>
module attributes {stable_mosaic.version = 11 : i64} {
  func.func @support_kernel(%arg0: i32, %arg1: memref<512x64xf32, #tpu.memory_space<vmem>>, %arg2: memref<64x128xf32, #tpu.memory_space<vmem>>, %arg3: memref<512x128xbf16, #tpu.memory_space<vmem>>) attributes {dimension_semantics = [#tpu.dimension_semantics<parallel>], iteration_bounds = array<i64: 1>, scalar_prefetch = 0 : i64, scratch_operands = 0 : i64, tpu.core_type = #tpu.core_type<tc>, window_params = [{transform_indices = @transform_0, window_bounds = array<i64: 512, 64>}, {pipeline_mode = #tpu.pipeline_mode<synchronous>, transform_indices = @transform_1, window_bounds = array<i64: 64, 128>}, {transform_indices = @transform_2, window_bounds = array<i64: 512, 128>}]} {
    %c0 = arith.constant 0 : index
    %c0_0 = arith.constant 0 : index
    %0 = vector.load %arg1[%c0, %c0_0] : memref<512x64xf32, #tpu.memory_space<vmem>>, vector<512x64xf32>
    %1 = arith.truncf %0 : vector<512x64xf32> to vector<512x64xbf16>
    %c0_1 = arith.constant 0 : index
    %c0_2 = arith.constant 0 : index
    %2 = vector.load %arg2[%c0_1, %c0_2] : memref<64x128xf32, #tpu.memory_space<vmem>>, vector<64x128xf32>
    %3 = arith.truncf %2 : vector<64x128xf32> to vector<64x128xbf16>
    %cst = arith.constant dense<0.000000e+00> : vector<512x128xf32>
    %4 = tpu.matmul %1, %3, %cst {dimension_numbers = #tpu.dot_dimension_numbers<[1], [0], [0], [1], [0, 0, 1, 1], [], []>} : vector<512x64xbf16>, vector<64x128xbf16>, vector<512x128xf32> -> vector<512x128xf32>
    %5 = arith.truncf %4 : vector<512x128xf32> to vector<512x128xbf16>
    %c0_3 = arith.constant 0 : index
    %c0_4 = arith.constant 0 : index
    %6 = vector.load %arg3[%c0_3, %c0_4] : memref<512x128xbf16, #tpu.memory_space<vmem>>, vector<512x128xbf16>
    tpu.vector_store %arg3[%c0_3, %c0_4], %5 {strides = array<i32>} : memref<512x128xbf16, #tpu.memory_space<vmem>>, vector<512x128xbf16>,
    return
  }
  func.func @transform_0(%arg0: i32) -> (i32, i32) {
    %c0_i32 = arith.constant 0 : i32
    %c0_i32_0 = arith.constant 0 : i32
    return %arg0, %c0_i32 : i32, i32
  }
  func.func @transform_1(%arg0: i32) -> (i32, i32) {
    %c0_i32 = arith.constant 0 : i32
    %c0_i32_0 = arith.constant 0 : i32
    %c0_i32_1 = arith.constant 0 : i32
    return %c0_i32, %c0_i32_0 : i32, i32
  }
  func.func @transform_2(%arg0: i32) -> (i32, i32) {
    %c0_i32 = arith.constant 0 : i32
    %c0_i32_0 = arith.constant 0 : i32
    return %arg0, %c0_i32 : i32, i32
  }
}

</mosaic_0001>

<bundles_post_ra>
// kernel: tpu_custom_call.1
= control target key start
LH: loop header
LB: loop body
LE: loop exit
PB: predicated region body
PF: predicated region fallthrough
CT: control target
= control target key end

     0   :  { %vm121_vm0 = vcmask 523264   ;;  %s1604_s0 = inlined_call_operand.vmem [shape: f32[512,64], index: 0, kind: input, shape index: {}]   ;;  %s1605_s1 = inlined_call_operand.vmem [shape: f32[64,128], index: 1, kind: input, shape index: {}]   ;;  %s1606_s2 = inlined_call_operand.hbm [shape: bf16[512,128], index: 2, kind: output, shape index: {}]  }
   0x1   :  { %v115_v0 = vld [vmem:[%s1605_s1 + $0x30] sm:$0xff]  ;;  %v116_v1 = vld [vmem:[%s1605_s1 + $0x38] sm:$0xff]  ;;  %v113_v2 = vld [vmem:[%s1605_s1 + $0x20] sm:$0xff] }
   0x2   :  { %v120_v3 = vpack.c.bf16 %v116_v1, %v115_v0  ;;  %v114_v4 = vld [vmem:[%s1605_s1 + $0x28] sm:$0xff]  ;;  %v111_v6 = vld [vmem:[%s1605_s1 + $0x10] sm:$0xff]  ;;  %v112_v7 = vld [vmem:[%s1605_s1 + $0x18] sm:$0xff] }
   0x3   :  { %v119_v5 = vpack.c.bf16 %v114_v4, %v113_v2  ;;  %v13_v8 = vld [vmem:[%s1604_s0] sm:$0xff]  ;;  %v14_v9 = vld [vmem:[%s1604_s0 + $0x8] sm:$0xff]  ;;  %v118_v14 = vpack.c.bf16 %v112_v7, %v111_v6  ;;  %v15_v18 = vld [vmem:[%s1604_s0 + $0x10] sm:$0xff] }
   0x4   :  { %1230 = vmatprep.subr.bf16.mxu0 %v120_v3  ;;  %1302 = vmatprep.subr.bf16.mxu1 %v120_v3  ;;  %v45_v10 = vld [vmem:[%s1604_s0 + $0x100] sm:$0xff]  ;;  %v46_v11 = vld [vmem:[%s1604_s0 + $0x108] sm:$0xff]  ;;  %v77_v12 = vpack.c.bf16 %v14_v9, %v13_v8  ;;  %v16_v19 = vld [vmem:[%s1604_s0 + $0x18] sm:$0xff] }
   0x5   :  { %1231 = vmatpush3.bf16.msra.mxu0 %v120_v3  ;;  %1306 = vmatpush3.bf16.msra.mxu1 %v120_v3  ;;  %v93_v13 = vpack.c.bf16 %v46_v11, %v45_v10  ;;  %v109_v15 = vld [vmem:[%s1605_s1] sm:$0xff]  ;;  %v110_v16 = vld [vmem:[%s1605_s1 + $0x8] sm:$0xff]  ;;  %v47_v20 = vld [vmem:[%s1604_s0 + $0x110] sm:$0xff]  ;;  %v78_v26 = vpack.c.bf16 %v16_v19, %v15_v18 }
   0x6   :  { %1232 = vmatprep.subr.bf16.mxu0 %v119_v5  ;;  %1303 = vmatprep.subr.bf16.mxu1 %v119_v5  ;;  %v117_v17 = vpack.c.bf16 %v110_v16, %v109_v15  ;;  %v48_v21 = vld [vmem:[%s1604_s0 + $0x118] sm:$0xff]  ;;  %v17_v22 = vld [vmem:[%s1604_s0 + $0x20] sm:$0xff]  ;;  %v18_v23 = vld [vmem:[%s1604_s0 + $0x28] sm:$0xff] }
   0x7   :  { %1238 = vmatprep.mubr.msk.bf16.mxu0 %vm121_vm0, %v77_v12  ;;  %1270 = vmatprep.mubr.msk.bf16.mxu1 %vm121_vm0, %v93_v13  ;;  %v49_v24 = vld [vmem:[%s1604_s0 + $0x120] sm:$0xff]  ;;  %v50_v25 = vld [vmem:[%s1604_s0 + $0x128] sm:$0xff]  ;;  %v94_v27 = vpack.c.bf16 %v48_v21, %v47_v20  ;;  %v79_v28 = vpack.c.bf16 %v18_v23, %v17_v22  ;;  %v19_v30 = vld [vmem:[%s1604_s0 + $0x30] sm:$0xff] }
   0x8   :  { %v95_v29 = vpack.c.bf16 %v50_v25, %v49_v24  ;;  %v20_v31 = vld [vmem:[%s1604_s0 + $0x38] sm:$0xff]  ;;  %v51_v32 = vld [vmem:[%s1604_s0 + $0x130] sm:$0xff]  ;;  %v21_v34 = vld [vmem:[%s1604_s0 + $0x40] sm:$0xff] }
   0x9   :  { %1233 = vmatpush3.bf16.msra.mxu0 %v119_v5  ;;  %1307 = vmatpush3.bf16.msra.mxu1 %v119_v5  ;;  %v52_v33 = vld [vmem:[%s1604_s0 + $0x138] sm:$0xff]  ;;  %v22_v35 = vld [vmem:[%s1604_s0 + $0x48] sm:$0xff]  ;;  %v53_v36 = vld [vmem:[%s1604_s0 + $0x140] sm:$0xff]  ;;  %v80_v38 = vpack.c.bf16 %v20_v31, %v19_v30 }
   0xa   :  { %1234 = vmatprep.subr.bf16.mxu0 %v118_v14  ;;  %1304 = vmatprep.subr.bf16.mxu1 %v118_v14  ;;  %v54_v37 = vld [vmem:[%s1604_s0 + $0x148] sm:$0xff]  ;;  %v96_v39 = vpack.c.bf16 %v52_v33, %v51_v32  ;;  %v81_v40 = vpack.c.bf16 %v22_v35, %v21_v34 }
   0xb   :  { %v97_v41 = vpack.c.bf16 %v54_v37, %v53_v36 }
   0xd   :  { %1235 = vmatpush3.bf16.msra.mxu0 %v118_v14  ;;  %1308 = vmatpush3.bf16.msra.mxu1 %v118_v14 }
   0xe   :  { %1236 = vmatprep.subr.bf16.mxu0 %v117_v17  ;;  %1305 = vmatprep.subr.bf16.mxu1 %v117_v17 }
  0x11   :  { %1237 = vmatpush3.bf16.msra.mxu0 %v117_v17  ;;  %1309 = vmatpush3.bf16.msra.mxu1 %v117_v17 }
  0x14   :  { %1239 = vmatmul.mubr.msk.bf16.vlgmr.msra.gmra.mxu0 %vm121_vm0, %v78_v26  ;;  %1271 = vmatmul.mubr.msk.bf16.vlgmr.msra.gmra.mxu1 %vm121_vm0, %v94_v27 }
  0x15   :  { %1242 = vmatprep.mubr.msk.bf16.mxu0 %vm121_vm0, %v79_v28  ;;  %1274 = vmatprep.mubr.msk.bf16.mxu1 %vm121_vm0, %v95_v29 }
  0x16   :  { %7 = vsyncpa [#allocation3], 0  ;;  %v23_v42 = vld [vmem:[%s1604_s0 + $0x50] sm:$0xff]  ;;  %v24_v43 = vld [vmem:[%s1604_s0 + $0x58] sm:$0xff] }
  0x17   :  { %v55_v44 = vld [vmem:[%s1604_s0 + $0x150] sm:$0xff]  ;;  %v56_v45 = vld [vmem:[%s1604_s0 + $0x158] sm:$0xff]  ;;  %v25_v46 = vld [vmem:[%s1604_s0 + $0x60] sm:$0xff]  ;;  %v82_v50 = vpack.c.bf16 %v24_v43, %v23_v42 }
  0x18   :  { %v26_v47 = vld [vmem:[%s1604_s0 + $0x68] sm:$0xff]  ;;  %v57_v48 = vld [vmem:[%s1604_s0 + $0x160] sm:$0xff]  ;;  %v98_v51 = vpack.c.bf16 %v56_v45, %v55_v44  ;;  %v27_v54 = vld [vmem:[%s1604_s0 + $0x70] sm:$0xff] }
  0x19   :  { %v58_v49 = vld [vmem:[%s1604_s0 + $0x168] sm:$0xff]  ;;  %v83_v52 = vpack.c.bf16 %v26_v47, %v25_v46  ;;  %v28_v55 = vld [vmem:[%s1604_s0 + $0x78] sm:$0xff]  ;;  %v59_v56 = vld [vmem:[%s1604_s0 + $0x170] sm:$0xff] }
  0x1a   :  { %v99_v53 = vpack.c.bf16 %v58_v49, %v57_v48  ;;  %v60_v57 = vld [vmem:[%s1604_s0 + $0x178] sm:$0xff]  ;;  %v29_v58 = vld [vmem:[%s1604_s0 + $0x80] sm:$0xff]  ;;  %v30_v59 = vld [vmem:[%s1604_s0 + $0x88] sm:$0xff]  ;;  %v84_v62 = vpack.c.bf16 %v28_v55, %v27_v54 }
  0x1b   :  { %v61_v60 = vld [vmem:[%s1604_s0 + $0x180] sm:$0xff]  ;;  %v62_v61 = vld [vmem:[%s1604_s0 + $0x188] sm:$0xff]  ;;  %v100_v63 = vpack.c.bf16 %v60_v57, %v59_v56  ;;  %v85_v0 = vpack.c.bf16 %v30_v59, %v29_v58  ;;  %v31_v2 = vld [vmem:[%s1604_s0 + $0x90] sm:$0xff] }
  0x1c   :  { %1243 = vmatmul.mubr.msk.bf16.gmra.mxu0 %vm121_vm0, %v80_v38  ;;  %1275 = vmatmul.mubr.msk.bf16.gmra.mxu1 %vm121_vm0, %v96_v39  ;;  %v101_v1 = vpack.c.bf16 %v62_v61, %v61_v60  ;;  %v32_v3 = vld [vmem:[%s1604_s0 + $0x98] sm:$0xff]  ;;  %v63_v4 = vld [vmem:[%s1604_s0 + $0x190] sm:$0xff]  ;;  %v33_v6 = vld [vmem:[%s1604_s0 + $0xa0] sm:$0xff] }
  0x1d   :  { %1246 = vmatprep.mubr.msk.bf16.mxu0 %vm121_vm0, %v81_v40  ;;  %1278 = vmatprep.mubr.msk.bf16.mxu1 %vm121_vm0, %v97_v41  ;;  %v64_v5 = vld [vmem:[%s1604_s0 + $0x198] sm:$0xff]  ;;  %v34_v7 = vld [vmem:[%s1604_s0 + $0xa8] sm:$0xff]  ;;  %v65_v8 = vld [vmem:[%s1604_s0 + $0x1a0] sm:$0xff]  ;;  %v86_v10 = vpack.c.bf16 %v32_v3, %v31_v2 }
  0x1e   :  { %v66_v9 = vld [vmem:[%s1604_s0 + $0x1a8] sm:$0xff]  ;;  %v102_v11 = vpack.c.bf16 %v64_v5, %v63_v4  ;;  %v87_v12 = vpack.c.bf16 %v34_v7, %v33_v6  ;;  %v35_v14 = vld [vmem:[%s1604_s0 + $0xb0] sm:$0xff]  ;;  %v36_v15 = vld [vmem:[%s1604_s0 + $0xb8] sm:$0xff] }
  0x1f   :  { %v103_v13 = vpack.c.bf16 %v66_v9, %v65_v8  ;;  %v67_v16 = vld [vmem:[%s1604_s0 + $0x1b0] sm:$0xff]  ;;  %v68_v17 = vld [vmem:[%s1604_s0 + $0x1b8] sm:$0xff]  ;;  %v37_v18 = vld [vmem:[%s1604_s0 + $0xc0] sm:$0xff]  ;;  %v88_v22 = vpack.c.bf16 %v36_v15, %v35_v14 }
  0x20   :  { %v38_v19 = vld [vmem:[%s1604_s0 + $0xc8] sm:$0xff]  ;;  %v69_v20 = vld [vmem:[%s1604_s0 + $0x1c0] sm:$0xff]  ;;  %v104_v23 = vpack.c.bf16 %v68_v17, %v67_v16  ;;  %v39_v26 = vld [vmem:[%s1604_s0 + $0xd0] sm:$0xff] }
  0x21   :  { %v70_v21 = vld [vmem:[%s1604_s0 + $0x1c8] sm:$0xff]  ;;  %v89_v24 = vpack.c.bf16 %v38_v19, %v37_v18  ;;  %v40_v27 = vld [vmem:[%s1604_s0 + $0xd8] sm:$0xff]  ;;  %v71_v28 = vld [vmem:[%s1604_s0 + $0x1d0] sm:$0xff] }
  0x22   :  { %v105_v25 = vpack.c.bf16 %v70_v21, %v69_v20  ;;  %v72_v29 = vld [vmem:[%s1604_s0 + $0x1d8] sm:$0xff]  ;;  %v41_v30 = vld [vmem:[%s1604_s0 + $0xe0] sm:$0xff]  ;;  %v42_v31 = vld [vmem:[%s1604_s0 + $0xe8] sm:$0xff]  ;;  %v90_v34 = vpack.c.bf16 %v40_v27, %v39_v26 }
  0x23   :  { %v73_v32 = vld [vmem:[%s1604_s0 + $0x1e0] sm:$0xff]  ;;  %v74_v33 = vld [vmem:[%s1604_s0 + $0x1e8] sm:$0xff]  ;;  %v106_v35 = vpack.c.bf16 %v72_v29, %v71_v28  ;;  %v91_v36 = vpack.c.bf16 %v42_v31, %v41_v30  ;;  %v43_v38 = vld [vmem:[%s1604_s0 + $0xf0] sm:$0xff] }
  0x24   :  { %1247 = vmatmul.mubr.msk.bf16.gmra.mxu0 %vm121_vm0, %v82_v50  ;;  %1279 = vmatmul.mubr.msk.bf16.gmra.mxu1 %vm121_vm0, %v98_v51  ;;  %v107_v37 = vpack.c.bf16 %v74_v33, %v73_v32  ;;  %v44_v39 = vld [vmem:[%s1604_s0 + $0xf8] sm:$0xff]  ;;  %v75_v40 = vld [vmem:[%s1604_s0 + $0x1f0] sm:$0xff] }
  0x25   :  { %1250 = vmatprep.mubr.msk.bf16.mxu0 %vm121_vm0, %v83_v52  ;;  %1282 = vmatprep.mubr.msk.bf16.mxu1 %vm121_vm0, %v99_v53  ;;  %v76_v41 = vld [vmem:[%s1604_s0 + $0x1f8] sm:$0xff]  ;;  %v92_v42 = vpack.c.bf16 %v44_v39, %v43_v38  ;;  %s1335_s0 = smov [#allocation2]  }
  0x26   :  { %v108_v43 = vpack.c.bf16 %v76_v41, %v75_v40  ;;  %s832_s1 = sshll.u32 %s1335_s0, 4  ;;  %s833_s1 = int_to_ptr.vmem [resolvable:$true] %s832_s1 }
  0x27   :  { %s1313_s9 = scalar_lea.vmem %s833_s1, 4096  ;;  %p1318_p1 = scmp.lt.s32.totalorder %s833_s1, %s833_s1 }
  0x28   :  { %p1314_p0 = scmp.ne.s32.totalorder %s833_s1, %s1313_s9  ;;  %p1319_p2 = scmp.lt.s32.totalorder %s1313_s9, %s1313_s9 }
  0x2a   :  { %p1320_p3 = por %p1319_p2, %p1318_p1 }
  0x2c   :  { %1251 = vmatmul.mubr.msk.bf16.gmra.mxu0 %vm121_vm0, %v84_v62  ;;  %1283 = vmatmul.mubr.msk.bf16.gmra.mxu1 %vm121_vm0, %v100_v63  ;;  %p1321_p4 = pnand %p1320_p3, %p1314_p0 }
  0x2d   :  { %1254 = vmatprep.mubr.msk.bf16.mxu0 %vm121_vm0, %v85_v0  ;;  %1286 = vmatprep.mubr.msk.bf16.mxu1 %vm121_vm0, %v101_v1 }
  0x34   :  { %1255 = vmatmul.mubr.msk.bf16.gmra.mxu0 %vm121_vm0, %v86_v10  ;;  %1287 = vmatmul.mubr.msk.bf16.gmra.mxu1 %vm121_vm0, %v102_v11 }
  0x35   :  { %1258 = vmatprep.mubr.msk.bf16.mxu0 %vm121_vm0, %v87_v12  ;;  %1290 = vmatprep.mubr.msk.bf16.mxu1 %vm121_vm0, %v103_v13 }
  0x3c   :  { %1259 = vmatmul.mubr.msk.bf16.gmra.mxu0 %vm121_vm0, %v88_v22  ;;  %1291 = vmatmul.mubr.msk.bf16.gmra.mxu1 %vm121_vm0, %v104_v23 }
  0x3d   :  { %1262 = vmatprep.mubr.msk.bf16.mxu0 %vm121_vm0, %v89_v24  ;;  %1294 = vmatprep.mubr.msk.bf16.mxu1 %vm121_vm0, %v105_v25 }
  0x44   :  { %1263 = vmatmul.mubr.msk.bf16.gmra.mxu0 %vm121_vm0, %v90_v34  ;;  %1295 = vmatmul.mubr.msk.bf16.gmra.mxu1 %vm121_vm0, %v106_v35 }
  0x45   :  { %1266 = vmatprep.mubr.msk.bf16.mxu0 %vm121_vm0, %v91_v36  ;;  %1298 = vmatprep.mubr.msk.bf16.mxu1 %vm121_vm0, %v107_v37 }
  0x4c   :  { %1267 = vmatmul.mubr.msk.bf16.gmra.mxu0 %vm121_vm0, %v92_v42  ;;  %1299 = vmatmul.mubr.msk.bf16.gmra.mxu1 %vm121_vm0, %v108_v43 }
  0xd4   :  { %v1240_v44 = vpop.f32.mrf.mxu0  ;;  %v1272_v45 = vpop.f32.mrf.mxu1 }
  0xd6   :  { %v252_v46 = vpop.f32.mrf.mxu0  ;;  %v380_v47 = vpop.f32.mrf.mxu1 }
  0xd8   :  { %v1241_v48 = vpop.f32.mrf.mxu0  ;;  %v1273_v49 = vpop.f32.mrf.mxu1 }
  0xd9   :  { %v1011_v50 = vpack.c.bf16 %v1241_v48, %v1240_v44  ;;  %v1091_v51 = vpack.c.bf16 %v1273_v49, %v1272_v45 }
  0xda   :  { %v255_v52 = vpop.f32.mrf.mxu0  ;;  %v383_v53 = vpop.f32.mrf.mxu1 }
  0xdb   :  { %1163 = vst [vmem:[#allocation2 + $0x8] sm:$0xff] %v1011_v50   ;;  %1179 = vst [vmem:[#allocation2 + $0x88] sm:$0xff] %v1091_v51   ;;  %v1006_v54 = vpack.c.bf16 %v255_v52, %v252_v46  ;;  %v1086_v55 = vpack.c.bf16 %v383_v53, %v380_v47 }
  0xdc   :  { %v1244_v56 = vpop.f32.mrf.mxu0  ;;  %v1276_v57 = vpop.f32.mrf.mxu1 }
  0xdd   :  { %1007 = vst [vmem:[#allocation2] sm:$0xff] %v1006_v54   ;;  %1178 = vst [vmem:[#allocation2 + $0x80] sm:$0xff] %v1086_v55  }
  0xde   :  { %v268_v58 = vpop.f32.mrf.mxu0  ;;  %v396_v59 = vpop.f32.mrf.mxu1 }
  0xe0   :  { %v1245_v60 = vpop.f32.mrf.mxu0  ;;  %v1277_v61 = vpop.f32.mrf.mxu1 }
  0xe1   :  { %v1021_v62 = vpack.c.bf16 %v1245_v60, %v1244_v56  ;;  %v1101_v63 = vpack.c.bf16 %v1277_v61, %v1276_v57 }
  0xe2   :  { %v271_v0 = vpop.f32.mrf.mxu0  ;;  %v399_v1 = vpop.f32.mrf.mxu1 }
  0xe3   :  { %1165 = vst [vmem:[#allocation2 + $0x18] sm:$0xff] %v1021_v62   ;;  %1181 = vst [vmem:[#allocation2 + $0x98] sm:$0xff] %v1101_v63   ;;  %v1016_v2 = vpack.c.bf16 %v271_v0, %v268_v58  ;;  %v1096_v3 = vpack.c.bf16 %v399_v1, %v396_v59 }
  0xe4   :  { %v1248_v4 = vpop.f32.mrf.mxu0  ;;  %v1280_v5 = vpop.f32.mrf.mxu1 }
  0xe5   :  { %1164 = vst [vmem:[#allocation2 + $0x10] sm:$0xff] %v1016_v2   ;;  %1180 = vst [vmem:[#allocation2 + $0x90] sm:$0xff] %v1096_v3  }
  0xe6   :  { %v284_v6 = vpop.f32.mrf.mxu0  ;;  %v412_v7 = vpop.f32.mrf.mxu1 }
  0xe8   :  { %v1249_v8 = vpop.f32.mrf.mxu0  ;;  %v1281_v9 = vpop.f32.mrf.mxu1 }
  0xe9   :  { %v1031_v10 = vpack.c.bf16 %v1249_v8, %v1248_v4  ;;  %v1111_v11 = vpack.c.bf16 %v1281_v9, %v1280_v5 }
  0xea   :  { %v287_v12 = vpop.f32.mrf.mxu0  ;;  %v415_v13 = vpop.f32.mrf.mxu1 }
  0xeb   :  { %1167 = vst [vmem:[#allocation2 + $0x28] sm:$0xff] %v1031_v10   ;;  %1183 = vst [vmem:[#allocation2 + $0xa8] sm:$0xff] %v1111_v11   ;;  %v1026_v14 = vpack.c.bf16 %v287_v12, %v284_v6  ;;  %v1106_v15 = vpack.c.bf16 %v415_v13, %v412_v7 }
  0xec   :  { %v1252_v16 = vpop.f32.mrf.mxu0  ;;  %v1284_v17 = vpop.f32.mrf.mxu1 }
  0xed   :  { %1166 = vst [vmem:[#allocation2 + $0x20] sm:$0xff] %v1026_v14   ;;  %1182 = vst [vmem:[#allocation2 + $0xa0] sm:$0xff] %v1106_v15  }
  0xee   :  { %v300_v18 = vpop.f32.mrf.mxu0  ;;  %v428_v19 = vpop.f32.mrf.mxu1 }
  0xf0   :  { %v1253_v20 = vpop.f32.mrf.mxu0  ;;  %v1285_v21 = vpop.f32.mrf.mxu1 }
  0xf1   :  { %v1041_v22 = vpack.c.bf16 %v1253_v20, %v1252_v16  ;;  %v1121_v23 = vpack.c.bf16 %v1285_v21, %v1284_v17 }
  0xf2   :  { %v303_v24 = vpop.f32.mrf.mxu0  ;;  %v431_v25 = vpop.f32.mrf.mxu1 }
  0xf3   :  { %1169 = vst [vmem:[#allocation2 + $0x38] sm:$0xff] %v1041_v22   ;;  %1185 = vst [vmem:[#allocation2 + $0xb8] sm:$0xff] %v1121_v23   ;;  %v1036_v26 = vpack.c.bf16 %v303_v24, %v300_v18  ;;  %v1116_v27 = vpack.c.bf16 %v431_v25, %v428_v19 }
  0xf4   :  { %v1256_v28 = vpop.f32.mrf.mxu0  ;;  %v1288_v29 = vpop.f32.mrf.mxu1 }
  0xf5   :  { %1168 = vst [vmem:[#allocation2 + $0x30] sm:$0xff] %v1036_v26   ;;  %1184 = vst [vmem:[#allocation2 + $0xb0] sm:$0xff] %v1116_v27  }
  0xf6   :  { %v316_v30 = vpop.f32.mrf.mxu0  ;;  %v444_v31 = vpop.f32.mrf.mxu1 }
  0xf8   :  { %v1257_v32 = vpop.f32.mrf.mxu0  ;;  %v1289_v33 = vpop.f32.mrf.mxu1 }
  0xf9   :  { %v1051_v34 = vpack.c.bf16 %v1257_v32, %v1256_v28  ;;  %v1131_v35 = vpack.c.bf16 %v1289_v33, %v1288_v29 }
  0xfa   :  { %v319_v36 = vpop.f32.mrf.mxu0  ;;  %v447_v37 = vpop.f32.mrf.mxu1 }
  0xfb   :  { %1171 = vst [vmem:[#allocation2 + $0x48] sm:$0xff] %v1051_v34   ;;  %1187 = vst [vmem:[#allocation2 + $0xc8] sm:$0xff] %v1131_v35   ;;  %v1046_v38 = vpack.c.bf16 %v319_v36, %v316_v30  ;;  %v1126_v39 = vpack.c.bf16 %v447_v37, %v444_v31 }
  0xfc   :  { %v1260_v40 = vpop.f32.mrf.mxu0  ;;  %v1292_v41 = vpop.f32.mrf.mxu1 }
  0xfd   :  { %1170 = vst [vmem:[#allocation2 + $0x40] sm:$0xff] %v1046_v38   ;;  %1186 = vst [vmem:[#allocation2 + $0xc0] sm:$0xff] %v1126_v39  }
  0xfe   :  { %v332_v42 = vpop.f32.mrf.mxu0  ;;  %v460_v43 = vpop.f32.mrf.mxu1 }
 0x100   :  { %v1261_v44 = vpop.f32.mrf.mxu0  ;;  %v1293_v45 = vpop.f32.mrf.mxu1 }
 0x101   :  { %v1061_v46 = vpack.c.bf16 %v1261_v44, %v1260_v40  ;;  %v1141_v47 = vpack.c.bf16 %v1293_v45, %v1292_v41 }
 0x102   :  { %v335_v48 = vpop.f32.mrf.mxu0  ;;  %v463_v49 = vpop.f32.mrf.mxu1 }
 0x103   :  { %1173 = vst [vmem:[#allocation2 + $0x58] sm:$0xff] %v1061_v46   ;;  %1189 = vst [vmem:[#allocation2 + $0xd8] sm:$0xff] %v1141_v47   ;;  %v1056_v50 = vpack.c.bf16 %v335_v48, %v332_v42  ;;  %v1136_v51 = vpack.c.bf16 %v463_v49, %v460_v43 }
 0x104   :  { %v1264_v52 = vpop.f32.mrf.mxu0  ;;  %v1296_v53 = vpop.f32.mrf.mxu1 }
 0x105   :  { %1172 = vst [vmem:[#allocation2 + $0x50] sm:$0xff] %v1056_v50   ;;  %1188 = vst [vmem:[#allocation2 + $0xd0] sm:$0xff] %v1136_v51  }
 0x106   :  { %v348_v54 = vpop.f32.mrf.mxu0  ;;  %v476_v55 = vpop.f32.mrf.mxu1 }
 0x108   :  { %v1265_v56 = vpop.f32.mrf.mxu0  ;;  %v1297_v57 = vpop.f32.mrf.mxu1 }
 0x109   :  { %v1071_v58 = vpack.c.bf16 %v1265_v56, %v1264_v52  ;;  %v1151_v59 = vpack.c.bf16 %v1297_v57, %v1296_v53 }
 0x10a   :  { %v351_v60 = vpop.f32.mrf.mxu0  ;;  %v479_v61 = vpop.f32.mrf.mxu1 }
 0x10b   :  { %1175 = vst [vmem:[#allocation2 + $0x68] sm:$0xff] %v1071_v58   ;;  %1191 = vst [vmem:[#allocation2 + $0xe8] sm:$0xff] %v1151_v59   ;;  %v1066_v62 = vpack.c.bf16 %v351_v60, %v348_v54  ;;  %v1146_v63 = vpack.c.bf16 %v479_v61, %v476_v55 }
 0x10c   :  { %v1268_v0 = vpop.f32.mrf.mxu0  ;;  %v1300_v1 = vpop.f32.mrf.mxu1 }
 0x10d   :  { %1174 = vst [vmem:[#allocation2 + $0x60] sm:$0xff] %v1066_v62   ;;  %1190 = vst [vmem:[#allocation2 + $0xe0] sm:$0xff] %v1146_v63  }
 0x10e   :  { %v364_v2 = vpop.f32.mrf.mxu0  ;;  %v492_v3 = vpop.f32.mrf.mxu1 }
 0x110   :  { %v1269_v4 = vpop.f32.mrf.mxu0  ;;  %v1301_v5 = vpop.f32.mrf.mxu1 }
 0x111   :  { %v1081_v6 = vpack.c.bf16 %v1269_v4, %v1268_v0  ;;  %v1161_v7 = vpack.c.bf16 %v1301_v5, %v1300_v1 }
 0x112   :  { %v367_v8 = vpop.f32.mrf.mxu0  ;;  %v495_v9 = vpop.f32.mrf.mxu1 }
 0x113   :  { %1177 = vst [vmem:[#allocation2 + $0x78] sm:$0xff] %v1081_v6   ;;  %1193 = vst [vmem:[#allocation2 + $0xf8] sm:$0xff] %v1161_v7   ;;  %v1076_v10 = vpack.c.bf16 %v367_v8, %v364_v2  ;;  %v1156_v11 = vpack.c.bf16 %v495_v9, %v492_v3 }
 0x115   :  { %1176 = vst [vmem:[#allocation2 + $0x70] sm:$0xff] %v1076_v10   ;;  %1192 = vst [vmem:[#allocation2 + $0xf0] sm:$0xff] %v1156_v11  }
 0x116   :  { %1324 = shalt.err (!%p1321_p4)
}
 0x117   :  { %s1336_s10 = smov 64   ;;  %s1337_s11 = smov 4  }
 0x118   :  { %838 = dma.vmem_to_hbm [thread:$0]  %s833_s1, 4096, %s1606_s2, [#allocation3], %s1336_s10, %s1336_s10, %s1337_s11  }
 0x119   :  { %1333 = dma.done.wait [#allocation3], 4096  }
 0x11a   :  { %1334 = vsyncadd [#allocation3], 4294963200 }
 0x11b   :  { %842 = vsyncpa [#allocation3], 1 }

</bundles_post_ra>
